<compile_context>
chip_gen: v7x
topology: tpu7x:2x2x1
jax: 0.10.0
libtpu: 0.0.40
codegen_flags: <defaults>
</compile_context>

<pallas_src>
import functools

import jax
import jax.numpy as jnp
from jax import lax
from jax.experimental import pallas as pl
from jax.experimental.pallas import tpu as pltpu


def _round_up(v, m):
    return ((v + m - 1) // m) * m


def _adj_storage_dtype():
    """1-byte adjacency on v6e/v7x (kernel is HBM-bound on A); bf16 elsewhere."""
    try:
        kind = jax.devices()[0].device_kind.lower()
    except Exception:
        return jnp.bfloat16
    if "v6" in kind or "v7" in kind:
        return jnp.int8
    return jnp.bfloat16


# -------- projection kernel: H = (X * out_deg^-0.5) @ W, emitted as bf16 --------
def _project_kernel(x_ref, w_ref, h_ref):
    h_ref[...] = jnp.dot(x_ref[...], w_ref[...],
                         preferred_element_type=jnp.float32).astype(h_ref.dtype)


# -------- aggregation kernel: out = (A @ H) * in_deg^-0.5 + bias ----------------
def _aggregate_kernel(a_ref, h_ref, nd_ref, b_ref, o_ref):
    """One (dst-row tile m, src tile k) grid step.

    a_ref : [TM, TK]  int8/bf16  adjacency block (dst rows, src cols)
    h_ref : [TK, Fp]  bf16       projected, source-normalized features
    nd_ref: [TM, 1]   f32        in-degree^-0.5 (dest norm) for this row tile
    b_ref : [1, Fp]   f32        bias, lane-padded
    o_ref : [TM, Fp]  f32        output row tile; resident accumulator across k
    """
    k = pl.program_id(1)

    @pl.when(k == 0)
    def _():
        o_ref[...] = jnp.zeros_like(o_ref)

    # A stored as int8 (v6e/v7x) or bf16 (v5e): 0/1 values are exact in both.
    # Upcast is a no-op for bf16 and rides spare VALU slots for int8.
    a = a_ref[...].astype(jnp.bfloat16)
    # Native bf16 MXU matmul with f32 accumulation into the resident output.
    o_ref[...] += jnp.dot(a, h_ref[...], preferred_element_type=jnp.float32)

    @pl.when(k == pl.num_programs(1) - 1)
    def _():
        # dest norm + bias epilogue; lane-dense store
        o_ref[...] = o_ref[...] * nd_ref[...] + b_ref[...]


@functools.partial(jax.jit, static_argnames=("tm", "tk"))
def gcn_forward(adj, x, weight, bias, *, tm=512, tk=2048):
    """adj: [N_dst, N_src] dense adjacency (adj[i, j] = 1 iff edge j -> i);
       x: [N_src, F_in]; weight: [F_in, F_out]; bias: [F_out]."""
    n_dst, n_src = adj.shape
    f_in = x.shape[1]
    f_out = weight.shape[1]

    # Degrees / norms (f32 reductions fuse with the cast; no extra N^2 pass).
    out_deg = jnp.maximum(jnp.sum(adj, axis=0, dtype=jnp.float32), 1.0)   # [N_src]
    in_deg = jnp.maximum(jnp.sum(adj, axis=1, dtype=jnp.float32), 1.0)    # [N_dst]
    norm_src = lax.rsqrt(out_deg)[:, None]     # folded into X below
    norm_dst = lax.rsqrt(in_deg)[:, None]      # applied in the epilogue

    # ---- tiling ----
    f_pad = _round_up(f_out, 128)                    # lane-dense output / MXU N dim
    tk = min(tk, _round_up(n_src, 128))              # src tile (lane axis of A)
    k_pad = _round_up(n_src, tk)
    tm = min(tm, _round_up(n_dst, 8))                # dst-row tile
    if _round_up(n_dst, tm) // tm < 2 and _round_up(n_dst, 8) >= 16:
        # Keep >=2 blocks on the "parallel" row axis (v7x: 2 TensorCores/chip).
        tm = _round_up(max(8, _round_up(n_dst, 8) // 2), 8)
    m_pad = _round_up(n_dst, tm)
    num_m = m_pad // tm
    num_k = k_pad // tk

    adj_dtype = _adj_storage_dtype()
    a_bytes = int(jnp.dtype(adj_dtype).itemsize)

    # ---- padded operands (padded src rows/cols contribute 0; padded dst rows are
    # sliced off; padded feature lanes are 0 in W and bias, sliced off) ----
    # TODO(synk): if DGL's optional edge_weight (u_mul_e) were used, A must stay
    # in a float dtype; 0/1 adjacency is exact in int8/bf16.
    a_p = jnp.pad(adj, ((0, m_pad - n_dst), (0, k_pad - n_src))).astype(adj_dtype)
    x_p = jnp.pad(x.astype(jnp.float32) * norm_src, ((0, k_pad - n_src), (0, 0)))
    nd_p = jnp.pad(norm_dst, ((0, m_pad - n_dst), (0, 0)))
    w_p = jnp.pad(weight.astype(jnp.float32), ((0, 0), (0, f_pad - f_out)))
    b_p = jnp.pad(bias.astype(jnp.float32)[None, :], ((0, 0), (0, f_pad - f_out)))

    # ---- projection: computed once over src rows (hoisted out of the (m,k) grid)
    proj_cost = pl.CostEstimate(
        flops=2 * k_pad * f_in * f_pad,
        transcendentals=0,
        bytes_accessed=k_pad * f_in * 4 + f_in * f_pad * 4 + k_pad * f_pad * 2)

    h_bf16 = pl.pallas_call(
        _project_kernel,
        out_shape=jax.ShapeDtypeStruct((k_pad, f_pad), jnp.bfloat16),
        grid_spec=pltpu.PrefetchScalarGridSpec(
            num_scalar_prefetch=0,
            grid=(num_k,),
            in_specs=[
                pl.BlockSpec((tk, f_in), lambda i: (i, 0)),       # X (src-normalized)
                pl.BlockSpec((f_in, f_pad), lambda i: (0, 0)),    # W (resident)
            ],
            out_specs=pl.BlockSpec((tk, f_pad), lambda i: (i, 0)),
        ),
        compiler_params=pltpu.CompilerParams(
            dimension_semantics=("parallel",),
            vmem_limit_bytes=32 * 1024 * 1024),
        cost_estimate=proj_cost,
    )(x_p, w_p)

    # ---- aggregation: out = (A @ H) * norm_dst + bias ----
    agg_cost = pl.CostEstimate(
        flops=2 * m_pad * k_pad * f_pad,
        transcendentals=0,
        bytes_accessed=(m_pad * k_pad * a_bytes        # A, streamed once
                        + k_pad * f_pad * 2 * num_m    # H re-streamed per row tile
                        + m_pad * f_pad * 4            # output
                        + m_pad * 4 + f_pad * 4))

    out = pl.pallas_call(
        _aggregate_kernel,
        out_shape=jax.ShapeDtypeStruct((m_pad, f_pad), jnp.float32),
        grid_spec=pltpu.PrefetchScalarGridSpec(
            num_scalar_prefetch=0,
            grid=(num_m, num_k),
            in_specs=[
                pl.BlockSpec((tm, tk), lambda m, k: (m, k)),       # A block
                pl.BlockSpec((tk, f_pad), lambda m, k: (k, 0)),    # H block (bf16)
                pl.BlockSpec((tm, 1), lambda m, k: (m, 0)),        # dest norm
                pl.BlockSpec((1, f_pad), lambda m, k: (0, 0)),     # bias (resident)
            ],
            out_specs=pl.BlockSpec((tm, f_pad), lambda m, k: (m, 0)),
        ),
        compiler_params=pltpu.CompilerParams(
            dimension_semantics=("parallel", "arbitrary"),
            vmem_limit_bytes=32 * 1024 * 1024),
        cost_estimate=agg_cost,
    )(a_p, h_bf16, nd_p, b_p)

    return out[:n_dst, :f_out]


def _xavier_uniform(key, shape):
    fan_in, fan_out = shape
    limit = (6.0 / (fan_in + fan_out)) ** 0.5
    return jax.random.uniform(key, shape, jnp.float32, -limit, limit)


def _reference(adj, x, weight, bias):
    out_deg = jnp.clip(adj.sum(axis=0), 1.0, None)
    in_deg = jnp.clip(adj.sum(axis=1), 1.0, None)
    feat = x * (out_deg ** -0.5)[:, None]
    h = feat @ weight                      # in_feats > out_feats: project first
    rst = adj @ h
    rst = rst * (in_deg ** -0.5)[:, None]
    return rst + bias[None, :]


if __name__ == "__main__":
    N, IN_FEATS, OUT_FEATS = 64, 32, 16    # in_feats > out_feats branch

    key = jax.random.PRNGKey(0)
    k_adj, k_x, k_w = jax.random.split(key, 3)

    # deterministic random graph + self-loops (no 0-in-degree nodes, mirroring
    # the module's allow_zero_in_degree check passing)
    adj = (jax.random.uniform(k_adj, (N, N)) < 0.15).astype(jnp.float32)
    adj = jnp.maximum(adj, jnp.eye(N, dtype=jnp.float32))

    x = jax.random.normal(k_x, (N, IN_FEATS), jnp.float32)
    weight = _xavier_uniform(k_w, (IN_FEATS, OUT_FEATS))   # init.xavier_uniform_
    bias = jnp.zeros((OUT_FEATS,), jnp.float32)            # init.zeros_

    out = jax.block_until_ready(gcn_forward(adj, x, weight, bias))
    ref = _reference(adj, x, weight, bias)

    assert out.shape == (N, OUT_FEATS)
    # bf16 H on the aggregation path => relaxed (but still tight) tolerance
    assert jnp.allclose(out, ref, atol=1e-2, rtol=1e-2), "mismatch vs reference"
    print("KERNEL_OK")
</pallas_src>

<mosaic_0001>
module attributes {stable_mosaic.version = 11 : i64} {
  func.func @_project_kernel(%arg0: i32, %arg1: memref<128x32xf32, #tpu.memory_space<vmem>>, %arg2: memref<32x128xf32, #tpu.memory_space<vmem>>, %arg3: memref<128x128xbf16, #tpu.memory_space<vmem>>) attributes {dimension_semantics = [#tpu.dimension_semantics<parallel>], iteration_bounds = array<i64: 1>, scalar_prefetch = 0 : i64, scratch_operands = 0 : i64, tpu.core_type = #tpu.core_type<tc>, window_params = [{transform_indices = @transform_0, window_bounds = array<i64: 128, 32>}, {pipeline_mode = #tpu.pipeline_mode<synchronous>, transform_indices = @transform_1, window_bounds = array<i64: 32, 128>}, {transform_indices = @transform_2, window_bounds = array<i64: 128, 128>}]} {
    %c0 = arith.constant 0 : index
    %c0_0 = arith.constant 0 : index
    %0 = vector.load %arg1[%c0, %c0_0] : memref<128x32xf32, #tpu.memory_space<vmem>>, vector<128x32xf32>
    %c0_1 = arith.constant 0 : index
    %c0_2 = arith.constant 0 : index
    %1 = vector.load %arg2[%c0_1, %c0_2] : memref<32x128xf32, #tpu.memory_space<vmem>>, vector<32x128xf32>
    %cst = arith.constant dense<0.000000e+00> : vector<128x128xf32>
    %2 = tpu.matmul %0, %1, %cst {dimension_numbers = #tpu.dot_dimension_numbers<[1], [0], [0], [1], [0, 0, 1, 1], [], []>} : vector<128x32xf32>, vector<32x128xf32>, vector<128x128xf32> -> vector<128x128xf32>
    %3 = arith.truncf %2 : vector<128x128xf32> to vector<128x128xbf16>
    %c0_3 = arith.constant 0 : index
    %c0_4 = arith.constant 0 : index
    %4 = vector.load %arg3[%c0_3, %c0_4] : memref<128x128xbf16, #tpu.memory_space<vmem>>, vector<128x128xbf16>
    tpu.vector_store %arg3[%c0_3, %c0_4], %3 {strides = array<i32>} : memref<128x128xbf16, #tpu.memory_space<vmem>>, vector<128x128xbf16>,
    return
  }
  func.func @transform_0(%arg0: i32) -> (i32, i32) {
    %c0_i32 = arith.constant 0 : i32
    %c0_i32_0 = arith.constant 0 : i32
    return %arg0, %c0_i32 : i32, i32
  }
  func.func @transform_1(%arg0: i32) -> (i32, i32) {
    %c0_i32 = arith.constant 0 : i32
    %c0_i32_0 = arith.constant 0 : i32
    %c0_i32_1 = arith.constant 0 : i32
    return %c0_i32, %c0_i32_0 : i32, i32
  }
  func.func @transform_2(%arg0: i32) -> (i32, i32) {
    %c0_i32 = arith.constant 0 : i32
    %c0_i32_0 = arith.constant 0 : i32
    return %arg0, %c0_i32 : i32, i32
  }
}

module attributes {stable_mosaic.version = 11 : i64} {
  func.func @_aggregate_kernel(%arg0: i32, %arg1: i32, %arg2: memref<32x128xbf16, #tpu.memory_space<vmem>>, %arg3: memref<128x128xbf16, #tpu.memory_space<vmem>>, %arg4: memref<32x1xf32, #tpu.memory_space<vmem>>, %arg5: memref<1x128xf32, #tpu.memory_space<vmem>>, %arg6: memref<32x128xf32, #tpu.memory_space<vmem>>) attributes {dimension_semantics = [#tpu.dimension_semantics<parallel>, #tpu.dimension_semantics<arbitrary>], iteration_bounds = array<i64: 2, 1>, scalar_prefetch = 0 : i64, scratch_operands = 0 : i64, tpu.core_type = #tpu.core_type<tc>, window_params = [{transform_indices = @transform_0, window_bounds = array<i64: 32, 128>}, {transform_indices = @transform_1, window_bounds = array<i64: 128, 128>}, {transform_indices = @transform_2, window_bounds = array<i64: 32, 1>}, {pipeline_mode = #tpu.pipeline_mode<synchronous>, transform_indices = @transform_3, window_bounds = array<i64: 1, 128>}, {transform_indices = @transform_4, window_bounds = array<i64: 32, 128>}]} {
    %c0_i32 = arith.constant 0 : i32
    %0 = arith.cmpi eq, %arg1, %c0_i32 : i32
    %1 = arith.extui %0 : i1 to i32
    %c0_i32_0 = arith.constant 0 : i32
    %2 = arith.cmpi ne, %1, %c0_i32_0 : i32
    scf.if %2 {
      %cst_10 = arith.constant 0.000000e+00 : f32
      %12 = vector.broadcast %cst_10 : f32 to vector<32x128xf32>
      %c0_11 = arith.constant 0 : index
      %c0_12 = arith.constant 0 : index
      %13 = vector.load %arg6[%c0_11, %c0_12] : memref<32x128xf32, #tpu.memory_space<vmem>>, vector<32x128xf32>
      tpu.vector_store %arg6[%c0_11, %c0_12], %12 {strides = array<i32>} : memref<32x128xf32, #tpu.memory_space<vmem>>, vector<32x128xf32>,
    } else {
    }
    %c0 = arith.constant 0 : index
    %c0_1 = arith.constant 0 : index
    %3 = vector.load %arg2[%c0, %c0_1] : memref<32x128xbf16, #tpu.memory_space<vmem>>, vector<32x128xbf16>
    %c0_2 = arith.constant 0 : index
    %c0_3 = arith.constant 0 : index
    %4 = vector.load %arg6[%c0_2, %c0_3] : memref<32x128xf32, #tpu.memory_space<vmem>>, vector<32x128xf32>
    %c0_4 = arith.constant 0 : index
    %c0_5 = arith.constant 0 : index
    %5 = vector.load %arg3[%c0_4, %c0_5] : memref<128x128xbf16, #tpu.memory_space<vmem>>, vector<128x128xbf16>
    %cst = arith.constant dense<0.000000e+00> : vector<32x128xf32>
    %6 = tpu.matmul %3, %5, %cst {dimension_numbers = #tpu.dot_dimension_numbers<[1], [0], [0], [1], [0, 0, 1, 1], [], []>} : vector<32x128xbf16>, vector<128x128xbf16>, vector<32x128xf32> -> vector<32x128xf32>
    %7 = arith.addf %4, %6 : vector<32x128xf32>
    %c0_6 = arith.constant 0 : index
    %c0_7 = arith.constant 0 : index
    %8 = vector.load %arg6[%c0_6, %c0_7] : memref<32x128xf32, #tpu.memory_space<vmem>>, vector<32x128xf32>
    tpu.vector_store %arg6[%c0_6, %c0_7], %7 {strides = array<i32>} : memref<32x128xf32, #tpu.memory_space<vmem>>, vector<32x128xf32>,
    %c0_i32_8 = arith.constant 0 : i32
    %9 = arith.cmpi eq, %arg1, %c0_i32_8 : i32
    %10 = arith.extui %9 : i1 to i32
    %c0_i32_9 = arith.constant 0 : i32
    %11 = arith.cmpi ne, %10, %c0_i32_9 : i32
    scf.if %11 {
      %c0_10 = arith.constant 0 : index
      %c0_11 = arith.constant 0 : index
      %12 = vector.load %arg6[%c0_10, %c0_11] : memref<32x128xf32, #tpu.memory_space<vmem>>, vector<32x128xf32>
      %c0_12 = arith.constant 0 : index
      %c0_13 = arith.constant 0 : index
      %13 = vector.load %arg4[%c0_12, %c0_13] : memref<32x1xf32, #tpu.memory_space<vmem>>, vector<32x1xf32>
      %14 = vector.broadcast %13 : vector<32x1xf32> to vector<32x128xf32>
      %15 = arith.mulf %12, %14 : vector<32x128xf32>
      %c0_14 = arith.constant 0 : index
      %c0_15 = arith.constant 0 : index
      %16 = vector.load %arg5[%c0_14, %c0_15] : memref<1x128xf32, #tpu.memory_space<vmem>>, vector<1x128xf32>
      %17 = vector.broadcast %16 : vector<1x128xf32> to vector<32x128xf32>
      %18 = arith.addf %15, %17 : vector<32x128xf32>
      %c0_16 = arith.constant 0 : index
      %c0_17 = arith.constant 0 : index
      %19 = vector.load %arg6[%c0_16, %c0_17] : memref<32x128xf32, #tpu.memory_space<vmem>>, vector<32x128xf32>
      tpu.vector_store %arg6[%c0_16, %c0_17], %18 {strides = array<i32>} : memref<32x128xf32, #tpu.memory_space<vmem>>, vector<32x128xf32>,
    } else {
    }
    return
  }
  func.func @transform_0(%arg0: i32, %arg1: i32) -> (i32, i32) {
    %c0_i32 = arith.constant 0 : i32
    return %arg0, %arg1 : i32, i32
  }
  func.func @transform_1(%arg0: i32, %arg1: i32) -> (i32, i32) {
    %c0_i32 = arith.constant 0 : i32
    %c0_i32_0 = arith.constant 0 : i32
    return %arg1, %c0_i32 : i32, i32
  }
  func.func @transform_2(%arg0: i32, %arg1: i32) -> (i32, i32) {
    %c0_i32 = arith.constant 0 : i32
    %c0_i32_0 = arith.constant 0 : i32
    return %arg0, %c0_i32 : i32, i32
  }
  func.func @transform_3(%arg0: i32, %arg1: i32) -> (i32, i32) {
    %c0_i32 = arith.constant 0 : i32
    %c0_i32_0 = arith.constant 0 : i32
    %c0_i32_1 = arith.constant 0 : i32
    return %c0_i32, %c0_i32_0 : i32, i32
  }
  func.func @transform_4(%arg0: i32, %arg1: i32) -> (i32, i32) {
    %c0_i32 = arith.constant 0 : i32
    %c0_i32_0 = arith.constant 0 : i32
    return %arg0, %c0_i32 : i32, i32
  }
}

</mosaic_0001>

<bundles_post_ra>
// kernel: gcn_forward.2
= control target key start
LH: loop header
LB: loop body
LE: loop exit
PB: predicated region body
PF: predicated region fallthrough
CT: control target
= control target key end

     0   :  { %vm31_vm0 = vcmask 261120   ;;  %s583_s1 = inlined_call_operand.vmem [shape: f32[32,128], index: 1, kind: input, shape index: {}]   ;;  %s584_s0 = inlined_call_operand.vmem [shape: f32[128,32], index: 0, kind: input, shape index: {}]   ;;  %s585_s2 = inlined_call_operand.vmem [shape: bf16[128,128], index: 2, kind: output, shape index: {}]  }
   0x1   :  { %v27_v0 = vld [vmem:[%s583_s1] sm:$0xff]  ;;  %v28_v1 = vld [vmem:[%s583_s1 + $0x8] sm:$0xff]  ;;  %v29_v2 = vld [vmem:[%s583_s1 + $0x10] sm:$0xff] }
   0x2   :  { %v456_v3 = vpack.c.bf16 %v28_v1, %v27_v0  ;;  %v30_v4 = vld [vmem:[%s583_s1 + $0x18] sm:$0xff]  ;;  %v11_v5 = vld [vmem:[%s584_s0] sm:$0xff]  ;;  %v12_v8 = vld [vmem:[%s584_s0 + $0x8] sm:$0xff] }
   0x3   :  { %v19_v6 = vld [vmem:[%s584_s0 + $0x40] sm:$0xff]  ;;  %v460_v7 = vpack.c.bf16 %v30_v4, %v29_v2  ;;  %432 = vmatprep.mubr.msk.f32.mxu0 %vm31_vm0, %v11_v5  ;;  %v20_v9 = vld [vmem:[%s584_s0 + $0x48] sm:$0xff]  ;;  %v13_v10 = vld [vmem:[%s584_s0 + $0x10] sm:$0xff] }
   0x4   :  { %444 = vmatprep.mubr.msk.f32.mxu1 %vm31_vm0, %v19_v6  ;;  %457 = vmatprep.subr.bf16.mxu0 %v456_v3  ;;  %v21_v11 = vld [vmem:[%s584_s0 + $0x50] sm:$0xff]  ;;  %v14_v12 = vld [vmem:[%s584_s0 + $0x18] sm:$0xff]  ;;  %v15_v14 = vld [vmem:[%s584_s0 + $0x20] sm:$0xff] }
   0x5   :  { %464 = vmatprep.subr.bf16.mxu1 %v456_v3  ;;  %459 = vmatpush3.bf16.msra.mxu0 %v456_v3  ;;  %v22_v13 = vld [vmem:[%s584_s0 + $0x58] sm:$0xff]  ;;  %v23_v15 = vld [vmem:[%s584_s0 + $0x60] sm:$0xff]  ;;  %v16_v16 = vld [vmem:[%s584_s0 + $0x28] sm:$0xff] }
   0x6   :  { %466 = vmatpush3.bf16.msra.mxu1 %v456_v3  ;;  %461 = vmatprep.subr.bf16.mxu0 %v460_v7  ;;  %v24_v17 = vld [vmem:[%s584_s0 + $0x68] sm:$0xff]  ;;  %v17_v18 = vld [vmem:[%s584_s0 + $0x30] sm:$0xff]  ;;  %v18_v20 = vld [vmem:[%s584_s0 + $0x38] sm:$0xff] }
   0x7   :  { %465 = vmatprep.subr.bf16.mxu1 %v460_v7  ;;  %v25_v19 = vld [vmem:[%s584_s0 + $0x70] sm:$0xff]  ;;  %v26_v21 = vld [vmem:[%s584_s0 + $0x78] sm:$0xff] }
   0x9   :  { %463 = vmatpush3.bf16.msra.mxu0 %v460_v7 }
   0xa   :  { %467 = vmatpush3.bf16.msra.mxu1 %v460_v7 }
   0xc   :  { %433 = vmatmul.mubr.msk.f32.vlgmr.msra.gmra.mrb[0].mxu0 %vm31_vm0, %v12_v8 }
   0xd   :  { %445 = vmatmul.mubr.msk.f32.vlgmr.msra.gmra.mrb[0].mxu1 %vm31_vm0, %v20_v9  ;;  %435 = vmatprep.mubr.msk.f32.mxu0 %vm31_vm0, %v13_v10 }
   0xe   :  { %447 = vmatprep.mubr.msk.f32.mxu1 %vm31_vm0, %v21_v11 }
  0x10   :  { %436 = vmatmul.mubr.msk.f32.gmra.mrb[2].mxu0 %vm31_vm0, %v14_v12 }
  0x11   :  { %448 = vmatmul.mubr.msk.f32.gmra.mrb[2].mxu1 %vm31_vm0, %v22_v13  ;;  %438 = vmatprep.mubr.msk.f32.mxu0 %vm31_vm0, %v15_v14 }
  0x12   :  { %450 = vmatprep.mubr.msk.f32.mxu1 %vm31_vm0, %v23_v15 }
  0x14   :  { %439 = vmatmul.mubr.msk.f32.gmra.mrb[4].mxu0 %vm31_vm0, %v16_v16 }
  0x15   :  { %451 = vmatmul.mubr.msk.f32.gmra.mrb[4].mxu1 %vm31_vm0, %v24_v17  ;;  %441 = vmatprep.mubr.msk.f32.mxu0 %vm31_vm0, %v17_v18 }
  0x16   :  { %453 = vmatprep.mubr.msk.f32.mxu1 %vm31_vm0, %v25_v19 }
  0x18   :  { %442 = vmatmul.mubr.msk.f32.gmra.mrb[6].mxu0 %vm31_vm0, %v18_v20 }
  0x19   :  { %454 = vmatmul.mubr.msk.f32.gmra.mrb[6].mxu1 %vm31_vm0, %v26_v21 }
  0xdf   :  { %v434_v22 = vpop.f32.mrb[0].mxu0 }
  0xe0   :  { %v446_v23 = vpop.f32.mrb[0].mxu1  ;;  %v146_v24 = vpop.f32.mrb[1].mxu0 }
  0xe1   :  { %v186_v25 = vpop.f32.mrb[1].mxu1  ;;  %v360_v26 = vpack.c.bf16 %v434_v22, %v146_v24 }
  0xe2   :  { %v380_v27 = vpack.c.bf16 %v446_v23, %v186_v25 }
  0xe3   :  { %361 = vst [vmem:[%s585_s2] sm:$0xff] %v360_v26   ;;  %v437_v28 = vpop.f32.mrb[2].mxu0 }
  0xe4   :  { %400 = vst [vmem:[%s585_s2 + $0x20] sm:$0xff] %v380_v27   ;;  %v449_v29 = vpop.f32.mrb[2].mxu1  ;;  %v156_v30 = vpop.f32.mrb[3].mxu0 }
  0xe5   :  { %v196_v31 = vpop.f32.mrb[3].mxu1  ;;  %v365_v32 = vpack.c.bf16 %v437_v28, %v156_v30 }
  0xe6   :  { %v385_v33 = vpack.c.bf16 %v449_v29, %v196_v31 }
  0xe7   :  { %397 = vst [vmem:[%s585_s2 + $0x8] sm:$0xff] %v365_v32   ;;  %v440_v34 = vpop.f32.mrb[4].mxu0 }
  0xe8   :  { %401 = vst [vmem:[%s585_s2 + $0x28] sm:$0xff] %v385_v33   ;;  %v452_v35 = vpop.f32.mrb[4].mxu1  ;;  %v166_v36 = vpop.f32.mrb[5].mxu0 }
  0xe9   :  { %v206_v37 = vpop.f32.mrb[5].mxu1  ;;  %v370_v38 = vpack.c.bf16 %v440_v34, %v166_v36 }
  0xea   :  { %v390_v39 = vpack.c.bf16 %v452_v35, %v206_v37 }
  0xeb   :  { %398 = vst [vmem:[%s585_s2 + $0x10] sm:$0xff] %v370_v38   ;;  %v443_v40 = vpop.f32.mrb[6].mxu0 }
  0xec   :  { %402 = vst [vmem:[%s585_s2 + $0x30] sm:$0xff] %v390_v39   ;;  %v455_v41 = vpop.f32.mrb[6].mxu1  ;;  %v176_v42 = vpop.f32.mrb[7].mxu0 }
  0xed   :  { %v216_v43 = vpop.f32.mrb[7].mxu1  ;;  %v375_v44 = vpack.c.bf16 %v443_v40, %v176_v42 }
  0xee   :  { %v395_v45 = vpack.c.bf16 %v455_v41, %v216_v43 }
  0xef   :  { %399 = vst [vmem:[%s585_s2 + $0x18] sm:$0xff] %v375_v44  }
  0xf0   :  { %403 = vst [vmem:[%s585_s2 + $0x38] sm:$0xff] %v395_v45  }

// kernel: gcn_forward.3
= control target key start
LH: loop header
LB: loop body
LE: loop exit
PB: predicated region body
PF: predicated region fallthrough
CT: control target
= control target key end

     0   :  { %s707_s15 = smov 0   ;;  %s709_s16 = smov 0   ;;  %s794_s0 = inlined_call_operand.vmem [shape: bf16[64,128], index: 0, kind: input, shape index: {}]   ;;  %s795_s1 = inlined_call_operand.vmem [shape: bf16[128,128], index: 1, kind: input, shape index: {}]   ;;  %s796_s2 = inlined_call_operand.vmem [shape: f32[64,1], index: 2, kind: input, shape index: {}]   ;;  %s797_s3 = inlined_call_operand.vmem [shape: f32[1,128], index: 3, kind: input, shape index: {}]   ;;  %s798_s4 = inlined_call_operand.vmem [shape: f32[64,128], index: 4, kind: output, shape index: {}]  }
   0x1   :  { %s711_s17 = smov 0  }
   0x2 LB: > { %s26_s18 = sadd.s32 1, %s674_s16  ;;  %p568_p0 = scmp.ge.s32.totalorder %s678_s17, 1  ;;  %s678_s17 = sphi %s711_s17, %s14_s17   ;;  %s674_s16 = sphi %s709_s16, %s800_s16   ;;  %s670_s15 = sphi %s707_s15, %s799_s15  }
   0x3   : > { %p28_p1 = scmp.ge.s32.totalorder %s26_s18, 2  ;;  %p202_p2 = scmp.lt.s32.totalorder %s678_s17, 3 }
   0x5   : > { %s802_s18 = smov (%p28_p1, %s26_s18), 0  ;;  %p203_p3 = pnand %p568_p0, %p202_p2 }
   0x6   : > { %v646_v0 = vld [vmem:[%s795_s1] sm:$0xff] (!%p203_p3)   ;;  %s569_s21 = sshll.u32 (!%p203_p3), %s670_s15, 2  ;;  %v647_v1 = vld [vmem:[%s795_s1 + $0x8] sm:$0xff] (!%p203_p3)   ;;  %v680_v2 = vmov (!%p203_p3), 0   ;;  %v648_v3 = vld [vmem:[%s795_s1 + $0x10] sm:$0xff] (!%p203_p3)   ;;  %v681_v6 = vmov (!%p203_p3), 0.0  }
   0x7   : > { %206 = sbr.rel (%p203_p3) target bundleno = 269 (0x10d), region = 36  ;;  %p242_p4 = scmp.lt.s32.totalorder (!%p203_p3), %s569_s21, 7  ;;  %598 = vmatprep.subr.bf16.mxu0 (!%p203_p3), %v646_v0  ;;  %644 = vset.pattern.permute.xlu0 (!%p203_p3), %v680_v2  ;;  %v649_v4 = vld [vmem:[%s795_s1 + $0x18] sm:$0xff] (!%p203_p3)   ;;  %v650_v9 = vld [vmem:[%s795_s1 + $0x20] sm:$0xff] (!%p203_p3)   ;;  %v651_v12 = vld [vmem:[%s795_s1 + $0x28] sm:$0xff] (!%p203_p3)  }
   0x8   : > { %599 = vmatpush3.bf16.msra.mxu0 (!%p203_p3), %v646_v0  ;;  %645 = vset.pattern.permute.xlu1 (!%p203_p3), %v680_v2  ;;  %v652_v13 = vld [vmem:[%s795_s1 + $0x30] sm:$0xff] (!%p203_p3)   ;;  %v653_v14 = vld [vmem:[%s795_s1 + $0x38] sm:$0xff] (!%p203_p3)   ;;  %v585_v36 = vld [vmem:[%s797_s3] ss:$0 sm:$0xff] (!%p203_p3) }
   0x9   : > { %600 = vmatprep.subr.bf16.mxu0 (!%p203_p3), %v647_v1 }
   0xc   : > { %601 = vmatpush3.bf16.msra.mxu0 (!%p203_p3), %v647_v1 }
   0xd   : > { %602 = vmatprep.subr.bf16.mxu0 (!%p203_p3), %v648_v3 }
   0xe   : > { %s804_s21 = smov (!%p242_p4, %s569_s21), 7 }
   0xf   : > { %s570_s26 = sshll.u32 %s804_s21, 2  ;;  %s572_s30 = sshll.u32 %s804_s21, 3 }
  0x10   : > { %s737_s29 = scalar_lea.vmem %s794_s0, %s570_s26  ;;  %s260_s9 = scalar_lea.vmem %s796_s2, %s572_s30  ;;  %603 = vmatpush3.bf16.msra.mxu0 %v648_v3 }
  0x11   : > { %s748_s12 = scalar_lea.vmem %s798_s4, %s572_s30  ;;  %v654_v5 = vld [vmem:[%s737_s29] sm:$0xff]   ;;  %v427_v8 = vld [vmem:[%s260_s9 + $0x10] sm:$0xff]  ;;  %604 = vmatprep.subr.bf16.mxu0 %v649_v4  ;;  %v426_v10 = vld [vmem:[%s260_s9 + $0x8] sm:$0xff] }
  0x12   : > { %273 = vst [vmem:[%s748_s12] sm:$0xff] %v681_v6  ;;  %274 = vst [vmem:[%s748_s12 + $0x8] sm:$0xff] %v681_v6  ;;  %614 = vmatprep.mubr.bf16.mxu0 %v654_v5  ;;  %v425_v7 = vld [vmem:[%s260_s9] sm:$0xff]  ;;  %441 = vperm.xlu1 %645, %v427_v8   ;;  %v428_v11 = vld [vmem:[%s260_s9 + $0x18] sm:$0xff] }
  0x13   : > { %275 = vst [vmem:[%s748_s12 + $0x10] sm:$0xff] %v681_v6  ;;  %431 = vperm.xlu0 %644, %v425_v7   ;;  %276 = vst [vmem:[%s748_s12 + $0x18] sm:$0xff] %v681_v6  ;;  %v655_v15 = vld [vmem:[%s737_s29 + $0x8] sm:$0xff]  }
  0x14   : > { %605 = vmatpush3.bf16.msra.mxu0 %v649_v4 }
  0x15   : > { %606 = vmatprep.subr.bf16.mxu0 %v650_v9 }
  0x16   : > { %446 = vperm.xlu1 %645, %v428_v11  }
  0x17   : > { %436 = vperm.xlu0 %644, %v426_v10  }
  0x18   : > { %607 = vmatpush3.bf16.msra.mxu0 %v650_v9 }
  0x19   : > { %608 = vmatprep.subr.bf16.mxu0 %v651_v12  ;;  %v281_v16 = vld [vmem:[%s748_s12] sm:$0xff]  ;;  %v282_v19 = vld [vmem:[%s748_s12 + $0x8] sm:$0xff] }
  0x1a   : > { %v283_v20 = vld [vmem:[%s748_s12 + $0x10] sm:$0xff] }
  0x1c   : > { %609 = vmatpush3.bf16.msra.mxu0 %v651_v12 }
  0x1d   : > { %610 = vmatprep.subr.bf16.mxu0 %v652_v13 }
  0x20   : > { %611 = vmatpush3.bf16.msra.mxu0 %v652_v13 }
  0x21   : > { %612 = vmatprep.subr.bf16.mxu0 %v653_v14 }
  0x24   : > { %613 = vmatpush3.bf16.msra.mxu0 %v653_v14 }
  0x27   : > { %615 = vmatmul.mubr.bf16.vlgmr.msra.gmra.mrb[0].mxu0 %v655_v15 }
  0x91   : > { %v442_v26 = vpop.permute.xlu1 %441 }
  0x92   : > { %v432_v27 = vpop.permute.xlu0 %431 }
  0x95   : > { %v447_v28 = vpop.permute.xlu1 %446 }
  0x96   : > { %v437_v31 = vpop.permute.xlu0 %436 }
  0xfa   : > { %v616_v17 = vpop.f32.mrb[0].mxu0 }
  0xfb   : > { %v395_v18 = vpop.f32.mrb[1].mxu0  ;;  %v412_v25 = vadd.f32 %v616_v17, %v283_v20 }
  0xfc   : > { %v410_v21 = vadd.f32 %v395_v18, %v281_v16  ;;  %v617_v22 = vpop.f32.mrb[2].mxu0 }
  0xfd   : > { %v398_v23 = vpop.f32.mrb[3].mxu0  ;;  %416 = vst [vmem:[%s748_s12 + $0x10] sm:$0xff] %v412_v25  ;;  %417 = vst [vmem:[%s748_s12 + $0x18] sm:$0xff] %v617_v22  ;;  %v452_v37 = vmul.f32 %v617_v22, %v447_v28 }
  0xfe   : > { %v411_v24 = vadd.f32 %v398_v23, %v282_v19  ;;  %414 = vst [vmem:[%s748_s12] sm:$0xff] %v410_v21 }
  0xff   : > { %v463_v41 = vadd.f32 %v585_v36, %v452_v37 }
 0x100   : > { %415 = vst [vmem:[%s748_s12 + $0x8] sm:$0xff] %v411_v24 }
 0x101   : > { %467 = vst [vmem:[%s748_s12 + $0x18] sm:$0xff] %v463_v41 }
 0x104   : > { %v423_v30 = vld [vmem:[%s748_s12 + $0x10] sm:$0xff] }
 0x105   : > { %v421_v29 = vld [vmem:[%s748_s12] sm:$0xff]  ;;  %v451_v34 = vmul.f32 %v442_v26, %v423_v30 }
 0x106   : > { %v449_v33 = vmul.f32 %v432_v27, %v421_v29 }
 0x107   : > { %v422_v32 = vld [vmem:[%s748_s12 + $0x8] sm:$0xff]  ;;  %v462_v40 = vadd.f32 %v585_v36, %v451_v34 }
 0x108   : > { %v450_v35 = vmul.f32 %v437_v31, %v422_v32  ;;  %v460_v38 = vadd.f32 %v585_v36, %v449_v33 }
 0x109   : > { %466 = vst [vmem:[%s748_s12 + $0x10] sm:$0xff] %v462_v40 }
 0x10a   : > { %v461_v39 = vadd.f32 %v585_v36, %v450_v35  ;;  %464 = vst [vmem:[%s748_s12] sm:$0xff] %v460_v38 }
 0x10c   : > { %465 = vst [vmem:[%s748_s12 + $0x8] sm:$0xff] %v461_v39 }
 0x10d PF: > { %s14_s17 = sadd.s32 1, %s678_s17   ;;  %s799_s15 = smov %s674_s16 }
 0x10e   : > { %p11_p5 = scmp.ge.s32.totalorder %s14_s17, 4   ;;  %s800_s16 = smov %s802_s18 }
 0x110   :  { %13 = sbr.rel (!%p11_p5) target bundleno = 2 (0x2), region = 80 }

</bundles_post_ra>
